<compile_context>
chip_gen: v7x
topology: tpu7x:2x2x1
jax: 0.10.0
libtpu: 0.0.40
codegen_flags: <defaults>
</compile_context>

<pallas_src>
import functools
import math

import jax
import jax.numpy as jnp
from jax.experimental import pallas as pl
from jax.experimental.pallas import tpu as pltpu


_BN_EVAL_SCALE = 1.0 / math.sqrt(1.0 + 1e-5)   # BatchNorm2d eval w/ default stats


# ----------------------------------------------------------------------------
# Fused Pallas kernel: one (batch, query-tile) per grid step
# ----------------------------------------------------------------------------

def _fused_kernel(x_full_ref, x_q_ref, w_in_ref, b_in_ref, w_kv_ref, w_q_ref,
                  w_out_ref, b_out_ref, ln_w_ref, ln_b_ref, gamma_ref, o_ref,
                  *, degree, eps):
    x_full = x_full_ref[0].astype(jnp.float32)        # (C, N)   keys/values pixels
    x_q = x_q_ref[0].astype(jnp.float32)              # (C, TQ)  query-tile pixels

    w_in = w_in_ref[...].astype(jnp.float32)          # (P, C)
    b_in = b_in_ref[...]                               # (P, 1)

    def kacn_features(x_cols):
        # inner 1x1 projection + tanh + Chebyshev recurrence, features stacked
        # along sublanes -> (D*P, ncols) so the KACN conv is ONE matmul.
        att0 = jnp.dot(w_in, x_cols, preferred_element_type=jnp.float32) + b_in
        u = jnp.tanh(att0)                             # (P, ncols)
        feats = [jnp.ones_like(u), u]                  # T_0, T_1
        for _ in range(2, degree + 1):
            feats.append(2.0 * u * feats[-1] - feats[-2])
        return jnp.concatenate(feats[:degree + 1], axis=0)

    feat_kv = kacn_features(x_full)                    # (D*P, N)
    feat_q = kacn_features(x_q)                        # (D*P, TQ)

    # KACN 1x1 convs (BatchNorm eval scale already folded into the weights).
    kv = jnp.dot(w_kv_ref[...].astype(jnp.float32), feat_kv,
                 preferred_element_type=jnp.float32)   # (2P, N)  = [k; v]
    q = jnp.dot(w_q_ref[...].astype(jnp.float32), feat_q,
                preferred_element_type=jnp.float32)    # (P, TQ)
    P = q.shape[0]
    k = kv[:P]                                         # (P, N)
    v = kv[P:]                                         # (P, N)

    # ---- self-attention, key-major: energy_T[j, i] = k_j . q_i ----
    energy_t = jax.lax.dot_general(
        k.astype(jnp.bfloat16), q.astype(jnp.bfloat16),
        (((0,), (0,)), ((), ())),
        preferred_element_type=jnp.float32)            # (N, TQ)
    energy_t = energy_t - jnp.max(energy_t, axis=0, keepdims=True)
    p_un = jnp.exp(energy_t)                           # unnormalized softmax
    denom = jnp.sum(p_un, axis=0, keepdims=True)       # (1, TQ)
    # out[p, i] = sum_j v[p, j] p_un[j, i] / denom[i]  (normalize the small
    # (P, TQ) result instead of the (N, TQ) score matrix)
    out = jnp.dot(v.astype(jnp.bfloat16), p_un.astype(jnp.bfloat16),
                  preferred_element_type=jnp.float32)  # (P, TQ)
    out = out * pl.reciprocal(denom, approx=True)

    # ---- outer 1x1 projection: (C, P) @ (P, TQ) + b -> (C, TQ) ----
    att_out = jnp.dot(w_out_ref[...].astype(jnp.float32), out,
                      preferred_element_type=jnp.float32) + b_out_ref[...]

    # ---- residual + LayerNorm2d (per-pixel norm over channels = sublanes) ----
    y = gamma_ref[0] * x_q + att_out                   # (C, TQ)
    mu = jnp.mean(y, axis=0, keepdims=True)
    var = jnp.mean((y - mu) ** 2, axis=0, keepdims=True)
    yn = (y - mu) * jax.lax.rsqrt(var + eps)
    o_ref[0] = (yn * ln_w_ref[...] + ln_b_ref[...]).astype(o_ref.dtype)


# ----------------------------------------------------------------------------
# Module forward (host-side glue: free reshapes + tiny weight restacking)
# ----------------------------------------------------------------------------

def self_kantention_2d(x, params, *, degree=3):
    """x: (B, C, H, W) float32  ->  (B, C, H, W)."""
    B, C, H, W = x.shape
    N = H * W
    P = params["w_inner"].shape[1]
    D = degree + 1

    # Query tile: lane-dense (multiple of 128) output stores; >1 tile keeps
    # both v7x TensorCores busy even at batch 1.
    TQ = 128 if (N % 128 == 0 and N > 128) else N
    NQT = N // TQ

    x_cn = x.reshape(B, C, N)                      # no data movement (row-major)

    w_in_pc = params["w_inner"].T                  # (P, C)
    b_in = params["b_inner"].reshape(P, 1)
    # (D, 3P, P) -> (3P, D*P), BatchNorm eval scale folded in.
    w_stk = (jnp.transpose(params["w_qkv"], (1, 0, 2)).reshape(3 * P, D * P)
             * _BN_EVAL_SCALE)
    w_q_feat = w_stk[:P]                           # (P,  D*P)  query weights
    w_kv_feat = w_stk[P:]                          # (2P, D*P)  [key; value] weights
    w_out_cp = params["w_outer"].T                 # (C, P)
    b_out = params["b_outer"].reshape(C, 1)
    ln_w = params["ln_w"].reshape(C, 1)
    ln_b = params["ln_b"].reshape(C, 1)
    gamma = params["gamma"]                        # (1,)

    kern = functools.partial(_fused_kernel, degree=degree, eps=1e-6)

    def rep(shape):                                # weight replicated per grid step
        return pl.BlockSpec(shape, lambda b, qi, _n=len(shape): (0,) * _n)

    out_cn = pl.pallas_call(
        kern,
        out_shape=jax.ShapeDtypeStruct((B, C, N), x.dtype),
        grid=(B, NQT),
        in_specs=[
            pl.BlockSpec((1, C, N), lambda b, qi: (b, 0, 0)),    # full pixels (k/v)
            pl.BlockSpec((1, C, TQ), lambda b, qi: (b, 0, qi)),  # query tile (q + residual)
            rep((P, C)), rep((P, 1)),                            # inner proj
            rep((2 * P, D * P)), rep((P, D * P)),                # fused KACN weights
            rep((C, P)), rep((C, 1)),                            # outer proj
            rep((C, 1)), rep((C, 1)),                            # layernorm affine
            pl.BlockSpec(memory_space=pltpu.MemorySpace.SMEM),   # gamma scalar
        ],
        out_specs=pl.BlockSpec((1, C, TQ), lambda b, qi: (b, 0, qi)),
        compiler_params=pltpu.CompilerParams(
            dimension_semantics=("parallel", "parallel")),
    )(x_cn, x_cn, w_in_pc, b_in, w_kv_feat, w_q_feat, w_out_cp, b_out,
      ln_w, ln_b, gamma)

    return out_cn.reshape(B, C, H, W)


# ----------------------------------------------------------------------------
# Parameter init (matches the module's __init__ conventions)
# ----------------------------------------------------------------------------

def init_params(key, C, P, degree):
    D = degree + 1
    ks = jax.random.split(key, 7)
    w_inner = jax.random.normal(ks[0], (C, P), jnp.float32) * 0.1
    b_inner = jax.random.normal(ks[1], (P,), jnp.float32) * 0.1
    w_outer = jax.random.normal(ks[2], (P, C), jnp.float32) * 0.1
    b_outer = jax.random.normal(ks[3], (C,), jnp.float32) * 0.1

    # KACN init: std = 1 / (input_dim * (degree + 1) * kernel_size**ndim)
    std = 1.0 / (P * D)

    def kacn_w(k):
        w = jax.random.normal(k, (P, P, D), jnp.float32) * std    # (out, in, d)
        return jnp.transpose(w, (2, 0, 1))                        # (D, out, in)

    wq, wk, wv = kacn_w(ks[4]), kacn_w(ks[5]), kacn_w(ks[6])
    w_qkv = jnp.concatenate([wq, wk, wv], axis=1)                 # (D, 3P, P)

    return dict(
        w_inner=w_inner, b_inner=b_inner,
        w_outer=w_outer, b_outer=b_outer,
        w_qkv=w_qkv,
        gamma=jnp.zeros((1,), jnp.float32),        # nn.Parameter(torch.zeros(1))
        ln_w=jnp.ones((C,), jnp.float32),
        ln_b=jnp.zeros((C,), jnp.float32),
    )


# ----------------------------------------------------------------------------
# Pure-JAX reference (same math, f32 throughout) for a sanity check
# ----------------------------------------------------------------------------

def reference(x, params, *, degree=3):
    B, C, H, W = x.shape
    N = H * W
    P = params["w_inner"].shape[1]
    xh = jnp.transpose(x, (0, 2, 3, 1))                         # (B,H,W,C)
    att0 = xh @ params["w_inner"] + params["b_inner"]           # (B,H,W,P)

    u = jnp.tanh(att0)
    feats = [jnp.ones_like(u), u]
    for _ in range(2, degree + 1):
        feats.append(2.0 * u * feats[-1] - feats[-2])
    qkv = sum(jnp.einsum("bhwi,oi->bhwo", feats[d], params["w_qkv"][d])
              for d in range(degree + 1)) * _BN_EVAL_SCALE       # (B,H,W,3P)
    q, k, v = qkv[..., :P], qkv[..., P:2 * P], qkv[..., 2 * P:]

    Q, K, V = (t.reshape(B, N, P) for t in (q, k, v))
    energy = jnp.einsum("bip,bjp->bij", Q, K)
    attw = jax.nn.softmax(energy, axis=-1)
    out = jnp.einsum("bij,bjp->bip", attw, V)                    # (B,N,P)
    att = (out @ params["w_outer"] + params["b_outer"]).reshape(B, H, W, C)

    y = params["gamma"][0] * xh + att
    mu = jnp.mean(y, -1, keepdims=True)
    var = jnp.mean((y - mu) ** 2, -1, keepdims=True)
    yn = (y - mu) / jnp.sqrt(var + 1e-6) * params["ln_w"] + params["ln_b"]
    return jnp.transpose(yn, (0, 3, 1, 2))


if __name__ == "__main__":
    key = jax.random.PRNGKey(0)
    kx, kp = jax.random.split(key)

    B, C, H, W = 2, 4, 16, 16          # input_dim = 4
    P, degree = 8, 3                   # inner_projection = 8, KACN degree = 3

    x = jax.random.normal(kx, (B, C, H, W), jnp.float32)
    params = init_params(kp, C, P, degree)

    out = jax.block_until_ready(self_kantention_2d(x, params, degree=degree))

    ref = reference(x, params, degree=degree)
    assert out.shape == (B, C, H, W)
    assert jnp.allclose(out, ref, atol=2e-3, rtol=2e-3), (
        "mismatch vs reference, max abs err = %g" % float(jnp.max(jnp.abs(out - ref))))

    print("KERNEL_OK")
</pallas_src>

<mosaic_0001>
module attributes {stable_mosaic.version = 11 : i64} {
  func.func @_fused_kernel(%arg0: i32, %arg1: i32, %arg2: memref<1x4x256xf32, #tpu.memory_space<vmem>>, %arg3: memref<1x4x128xf32, #tpu.memory_space<vmem>>, %arg4: memref<8x4xf32, #tpu.memory_space<vmem>>, %arg5: memref<8x1xf32, #tpu.memory_space<vmem>>, %arg6: memref<16x32xf32, #tpu.memory_space<vmem>>, %arg7: memref<8x32xf32, #tpu.memory_space<vmem>>, %arg8: memref<4x8xf32, #tpu.memory_space<vmem>>, %arg9: memref<4x1xf32, #tpu.memory_space<vmem>>, %arg10: memref<4x1xf32, #tpu.memory_space<vmem>>, %arg11: memref<4x1xf32, #tpu.memory_space<vmem>>, %arg12: memref<1xf32, #tpu.memory_space<smem>>, %arg13: memref<1x4x128xf32, #tpu.memory_space<vmem>>) attributes {dimension_semantics = [#tpu.dimension_semantics<parallel>, #tpu.dimension_semantics<parallel>], iteration_bounds = array<i64: 2, 2>, scalar_prefetch = 0 : i64, scratch_operands = 0 : i64, tpu.core_type = #tpu.core_type<tc>, window_params = [{transform_indices = @transform_0, window_bounds = array<i64: 1, 4, 256>}, {transform_indices = @transform_1, window_bounds = array<i64: 1, 4, 128>}, {pipeline_mode = #tpu.pipeline_mode<synchronous>, transform_indices = @transform_2, window_bounds = array<i64: 8, 4>}, {pipeline_mode = #tpu.pipeline_mode<synchronous>, transform_indices = @transform_3, window_bounds = array<i64: 8, 1>}, {pipeline_mode = #tpu.pipeline_mode<synchronous>, transform_indices = @transform_4, window_bounds = array<i64: 16, 32>}, {pipeline_mode = #tpu.pipeline_mode<synchronous>, transform_indices = @transform_5, window_bounds = array<i64: 8, 32>}, {pipeline_mode = #tpu.pipeline_mode<synchronous>, transform_indices = @transform_6, window_bounds = array<i64: 4, 8>}, {pipeline_mode = #tpu.pipeline_mode<synchronous>, transform_indices = @transform_7, window_bounds = array<i64: 4, 1>}, {pipeline_mode = #tpu.pipeline_mode<synchronous>, transform_indices = @transform_8, window_bounds = array<i64: 4, 1>}, {pipeline_mode = #tpu.pipeline_mode<synchronous>, transform_indices = @transform_9, window_bounds = array<i64: 4, 1>}, {transform_indices = @transform_10, window_bounds = array<i64: 1>}, {transform_indices = @transform_11, window_bounds = array<i64: 1, 4, 128>}]} {
    %c0 = arith.constant 0 : index
    %c0_0 = arith.constant 0 : index
    %c0_1 = arith.constant 0 : index
    %0 = vector.load %arg2[%c0, %c0_0, %c0_1] : memref<1x4x256xf32, #tpu.memory_space<vmem>>, vector<1x4x256xf32>
    %1 = vector.shape_cast %0 : vector<1x4x256xf32> to vector<4x256xf32>
    %c0_2 = arith.constant 0 : index
    %c0_3 = arith.constant 0 : index
    %c0_4 = arith.constant 0 : index
    %2 = vector.load %arg3[%c0_2, %c0_3, %c0_4] : memref<1x4x128xf32, #tpu.memory_space<vmem>>, vector<1x4x128xf32>
    %3 = vector.shape_cast %2 : vector<1x4x128xf32> to vector<4x128xf32>
    %c0_5 = arith.constant 0 : index
    %c0_6 = arith.constant 0 : index
    %4 = vector.load %arg4[%c0_5, %c0_6] : memref<8x4xf32, #tpu.memory_space<vmem>>, vector<8x4xf32>
    %c0_7 = arith.constant 0 : index
    %c0_8 = arith.constant 0 : index
    %5 = vector.load %arg5[%c0_7, %c0_8] : memref<8x1xf32, #tpu.memory_space<vmem>>, vector<8x1xf32>
    %cst = arith.constant dense<0.000000e+00> : vector<8x256xf32>
    %6 = tpu.matmul %4, %1, %cst {dimension_numbers = #tpu.dot_dimension_numbers<[1], [0], [0], [1], [0, 0, 1, 1], [], []>} : vector<8x4xf32>, vector<4x256xf32>, vector<8x256xf32> -> vector<8x256xf32>
    %7 = vector.broadcast %5 : vector<8x1xf32> to vector<8x256xf32>
    %8 = arith.addf %6, %7 : vector<8x256xf32>
    %9 = math.tanh %8 : vector<8x256xf32>
    %cst_9 = arith.constant 1.000000e+00 : f32
    %10 = vector.broadcast %cst_9 : f32 to vector<8x256xf32>
    %cst_10 = arith.constant 2.000000e+00 : f32
    %11 = vector.broadcast %cst_10 : f32 to vector<8x256xf32>
    %12 = arith.mulf %11, %9 : vector<8x256xf32>
    %13 = arith.mulf %12, %9 : vector<8x256xf32>
    %14 = arith.subf %13, %10 : vector<8x256xf32>
    %cst_11 = arith.constant 2.000000e+00 : f32
    %15 = vector.broadcast %cst_11 : f32 to vector<8x256xf32>
    %16 = arith.mulf %15, %9 : vector<8x256xf32>
    %17 = arith.mulf %16, %14 : vector<8x256xf32>
    %18 = arith.subf %17, %9 : vector<8x256xf32>
    %19 = tpu.concatenate %10, %9, %14, %18 in 0 : vector<8x256xf32>, vector<8x256xf32>, vector<8x256xf32>, vector<8x256xf32> -> vector<32x256xf32>
    %cst_12 = arith.constant dense<0.000000e+00> : vector<8x128xf32>
    %20 = tpu.matmul %4, %3, %cst_12 {dimension_numbers = #tpu.dot_dimension_numbers<[1], [0], [0], [1], [0, 0, 1, 1], [], []>} : vector<8x4xf32>, vector<4x128xf32>, vector<8x128xf32> -> vector<8x128xf32>
    %21 = vector.broadcast %5 : vector<8x1xf32> to vector<8x128xf32>
    %22 = arith.addf %20, %21 : vector<8x128xf32>
    %23 = math.tanh %22 : vector<8x128xf32>
    %cst_13 = arith.constant 1.000000e+00 : f32
    %24 = vector.broadcast %cst_13 : f32 to vector<8x128xf32>
    %cst_14 = arith.constant 2.000000e+00 : f32
    %25 = vector.broadcast %cst_14 : f32 to vector<8x128xf32>
    %26 = arith.mulf %25, %23 : vector<8x128xf32>
    %27 = arith.mulf %26, %23 : vector<8x128xf32>
    %28 = arith.subf %27, %24 : vector<8x128xf32>
    %cst_15 = arith.constant 2.000000e+00 : f32
    %29 = vector.broadcast %cst_15 : f32 to vector<8x128xf32>
    %30 = arith.mulf %29, %23 : vector<8x128xf32>
    %31 = arith.mulf %30, %28 : vector<8x128xf32>
    %32 = arith.subf %31, %23 : vector<8x128xf32>
    %33 = tpu.concatenate %24, %23, %28, %32 in 0 : vector<8x128xf32>, vector<8x128xf32>, vector<8x128xf32>, vector<8x128xf32> -> vector<32x128xf32>
    %c0_16 = arith.constant 0 : index
    %c0_17 = arith.constant 0 : index
    %34 = vector.load %arg6[%c0_16, %c0_17] : memref<16x32xf32, #tpu.memory_space<vmem>>, vector<16x32xf32>
    %cst_18 = arith.constant dense<0.000000e+00> : vector<16x256xf32>
    %35 = tpu.matmul %34, %19, %cst_18 {dimension_numbers = #tpu.dot_dimension_numbers<[1], [0], [0], [1], [0, 0, 1, 1], [], []>} : vector<16x32xf32>, vector<32x256xf32>, vector<16x256xf32> -> vector<16x256xf32>
    %c0_19 = arith.constant 0 : index
    %c0_20 = arith.constant 0 : index
    %36 = vector.load %arg7[%c0_19, %c0_20] : memref<8x32xf32, #tpu.memory_space<vmem>>, vector<8x32xf32>
    %cst_21 = arith.constant dense<0.000000e+00> : vector<8x128xf32>
    %37 = tpu.matmul %36, %33, %cst_21 {dimension_numbers = #tpu.dot_dimension_numbers<[1], [0], [0], [1], [0, 0, 1, 1], [], []>} : vector<8x32xf32>, vector<32x128xf32>, vector<8x128xf32> -> vector<8x128xf32>
    %38 = vector.extract_strided_slice %35 {offsets = [0, 0], sizes = [8, 256], strides = [1, 1]} : vector<16x256xf32> to vector<8x256xf32>
    %39 = vector.extract_strided_slice %35 {offsets = [8, 0], sizes = [8, 256], strides = [1, 1]} : vector<16x256xf32> to vector<8x256xf32>
    %40 = arith.truncf %38 : vector<8x256xf32> to vector<8x256xbf16>
    %41 = arith.truncf %37 : vector<8x128xf32> to vector<8x128xbf16>
    %cst_22 = arith.constant dense<0.000000e+00> : vector<256x128xf32>
    %42 = tpu.matmul %40, %41, %cst_22 {dimension_numbers = #tpu.dot_dimension_numbers<[0], [0], [1], [1], [0, 1, 1, 1], [], []>} : vector<8x256xbf16>, vector<8x128xbf16>, vector<256x128xf32> -> vector<256x128xf32>
    %cst_23 = arith.constant dense<0xFF800000> : vector<128xf32>
    %43 = vector.multi_reduction <maximumf>, %42, %cst_23 [0] : vector<256x128xf32> to vector<128xf32>
    %44 = vector.shape_cast %43 : vector<128xf32> to vector<1x128xf32>
    %45 = vector.broadcast %44 : vector<1x128xf32> to vector<256x128xf32>
    %46 = arith.subf %42, %45 : vector<256x128xf32>
    %47 = math.exp %46 : vector<256x128xf32>
    %cst_24 = arith.constant dense<0.000000e+00> : vector<128xf32>
    %48 = vector.multi_reduction <add>, %47, %cst_24 [0] : vector<256x128xf32> to vector<128xf32>
    %49 = vector.shape_cast %48 : vector<128xf32> to vector<1x128xf32>
    %50 = arith.truncf %39 : vector<8x256xf32> to vector<8x256xbf16>
    %51 = arith.truncf %47 : vector<256x128xf32> to vector<256x128xbf16>
    %cst_25 = arith.constant dense<0.000000e+00> : vector<8x128xf32>
    %52 = tpu.matmul %50, %51, %cst_25 {dimension_numbers = #tpu.dot_dimension_numbers<[1], [0], [0], [1], [0, 0, 1, 1], [], []>} : vector<8x256xbf16>, vector<256x128xbf16>, vector<8x128xf32> -> vector<8x128xf32>
    %53 = tpu.reciprocal %49 {approx = true} : vector<1x128xf32> -> vector<1x128xf32>
    %54 = vector.broadcast %53 : vector<1x128xf32> to vector<8x128xf32>
    %55 = arith.mulf %52, %54 : vector<8x128xf32>
    %c0_26 = arith.constant 0 : index
    %c0_27 = arith.constant 0 : index
    %56 = vector.load %arg8[%c0_26, %c0_27] : memref<4x8xf32, #tpu.memory_space<vmem>>, vector<4x8xf32>
    %cst_28 = arith.constant dense<0.000000e+00> : vector<4x128xf32>
    %57 = tpu.matmul %56, %55, %cst_28 {dimension_numbers = #tpu.dot_dimension_numbers<[1], [0], [0], [1], [0, 0, 1, 1], [], []>} : vector<4x8xf32>, vector<8x128xf32>, vector<4x128xf32> -> vector<4x128xf32>
    %c0_29 = arith.constant 0 : index
    %c0_30 = arith.constant 0 : index
    %58 = vector.load %arg9[%c0_29, %c0_30] : memref<4x1xf32, #tpu.memory_space<vmem>>, vector<4x1xf32>
    %59 = vector.broadcast %58 : vector<4x1xf32> to vector<4x128xf32>
    %60 = arith.addf %57, %59 : vector<4x128xf32>
    %c0_31 = arith.constant 0 : index
    %61 = memref.load %arg12[%c0_31] : memref<1xf32, #tpu.memory_space<smem>>
    %62 = vector.broadcast %61 : f32 to vector<4x128xf32>
    %63 = arith.mulf %62, %3 : vector<4x128xf32>
    %64 = arith.addf %63, %60 : vector<4x128xf32>
    %cst_32 = arith.constant dense<0.000000e+00> : vector<128xf32>
    %65 = vector.multi_reduction <add>, %64, %cst_32 [0] : vector<4x128xf32> to vector<128xf32>
    %66 = vector.shape_cast %65 : vector<128xf32> to vector<1x128xf32>
    %cst_33 = arith.constant 4.000000e+00 : f32
    %67 = vector.broadcast %cst_33 : f32 to vector<1x128xf32>
    %68 = arith.divf %66, %67 : vector<1x128xf32>
    %69 = vector.broadcast %68 : vector<1x128xf32> to vector<4x128xf32>
    %70 = arith.subf %64, %69 : vector<4x128xf32>
    %71 = arith.mulf %70, %70 : vector<4x128xf32>
    %cst_34 = arith.constant dense<0.000000e+00> : vector<128xf32>
    %72 = vector.multi_reduction <add>, %71, %cst_34 [0] : vector<4x128xf32> to vector<128xf32>
    %73 = vector.shape_cast %72 : vector<128xf32> to vector<1x128xf32>
    %cst_35 = arith.constant 4.000000e+00 : f32
    %74 = vector.broadcast %cst_35 : f32 to vector<1x128xf32>
    %75 = arith.divf %73, %74 : vector<1x128xf32>
    %76 = vector.broadcast %68 : vector<1x128xf32> to vector<4x128xf32>
    %77 = arith.subf %64, %76 : vector<4x128xf32>
    %cst_36 = arith.constant 9.99999997E-7 : f32
    %78 = vector.broadcast %cst_36 : f32 to vector<1x128xf32>
    %79 = arith.addf %75, %78 : vector<1x128xf32>
    %80 = math.rsqrt %79 : vector<1x128xf32>
    %81 = vector.broadcast %80 : vector<1x128xf32> to vector<4x128xf32>
    %82 = arith.mulf %77, %81 : vector<4x128xf32>
    %c0_37 = arith.constant 0 : index
    %c0_38 = arith.constant 0 : index
    %83 = vector.load %arg10[%c0_37, %c0_38] : memref<4x1xf32, #tpu.memory_space<vmem>>, vector<4x1xf32>
    %84 = vector.broadcast %83 : vector<4x1xf32> to vector<4x128xf32>
    %85 = arith.mulf %82, %84 : vector<4x128xf32>
    %c0_39 = arith.constant 0 : index
    %c0_40 = arith.constant 0 : index
    %86 = vector.load %arg11[%c0_39, %c0_40] : memref<4x1xf32, #tpu.memory_space<vmem>>, vector<4x1xf32>
    %87 = vector.broadcast %86 : vector<4x1xf32> to vector<4x128xf32>
    %88 = arith.addf %85, %87 : vector<4x128xf32>
    %c0_41 = arith.constant 0 : index
    %c0_42 = arith.constant 0 : index
    %c0_43 = arith.constant 0 : index
    %89 = vector.load %arg13[%c0_41, %c0_42, %c0_43] : memref<1x4x128xf32, #tpu.memory_space<vmem>>, vector<1x4x128xf32>
    %90 = vector.shape_cast %89 : vector<1x4x128xf32> to vector<4x128xf32>
    %91 = vector.shape_cast %88 : vector<4x128xf32> to vector<1x4x128xf32>
    tpu.vector_store %arg13[%c0_41, %c0_42, %c0_43], %91 {strides = array<i32>} : memref<1x4x128xf32, #tpu.memory_space<vmem>>, vector<1x4x128xf32>,
    return
  }
  func.func @transform_0(%arg0: i32, %arg1: i32) -> (i32, i32, i32) {
    %c0_i32 = arith.constant 0 : i32
    %c0_i32_0 = arith.constant 0 : i32
    %c0_i32_1 = arith.constant 0 : i32
    return %arg0, %c0_i32, %c0_i32_0 : i32, i32, i32
  }
  func.func @transform_1(%arg0: i32, %arg1: i32) -> (i32, i32, i32) {
    %c0_i32 = arith.constant 0 : i32
    %c0_i32_0 = arith.constant 0 : i32
    return %arg0, %c0_i32, %arg1 : i32, i32, i32
  }
  func.func @transform_2(%arg0: i32, %arg1: i32) -> (i32, i32) {
    %c0_i32 = arith.constant 0 : i32
    %c0_i32_0 = arith.constant 0 : i32
    %c0_i32_1 = arith.constant 0 : i32
    return %c0_i32, %c0_i32_0 : i32, i32
  }
  func.func @transform_3(%arg0: i32, %arg1: i32) -> (i32, i32) {
    %c0_i32 = arith.constant 0 : i32
    %c0_i32_0 = arith.constant 0 : i32
    %c0_i32_1 = arith.constant 0 : i32
    return %c0_i32, %c0_i32_0 : i32, i32
  }
  func.func @transform_4(%arg0: i32, %arg1: i32) -> (i32, i32) {
    %c0_i32 = arith.constant 0 : i32
    %c0_i32_0 = arith.constant 0 : i32
    %c0_i32_1 = arith.constant 0 : i32
    return %c0_i32, %c0_i32_0 : i32, i32
  }
  func.func @transform_5(%arg0: i32, %arg1: i32) -> (i32, i32) {
    %c0_i32 = arith.constant 0 : i32
    %c0_i32_0 = arith.constant 0 : i32
    %c0_i32_1 = arith.constant 0 : i32
    return %c0_i32, %c0_i32_0 : i32, i32
  }
  func.func @transform_6(%arg0: i32, %arg1: i32) -> (i32, i32) {
    %c0_i32 = arith.constant 0 : i32
    %c0_i32_0 = arith.constant 0 : i32
    %c0_i32_1 = arith.constant 0 : i32
    return %c0_i32, %c0_i32_0 : i32, i32
  }
  func.func @transform_7(%arg0: i32, %arg1: i32) -> (i32, i32) {
    %c0_i32 = arith.constant 0 : i32
    %c0_i32_0 = arith.constant 0 : i32
    %c0_i32_1 = arith.constant 0 : i32
    return %c0_i32, %c0_i32_0 : i32, i32
  }
  func.func @transform_8(%arg0: i32, %arg1: i32) -> (i32, i32) {
    %c0_i32 = arith.constant 0 : i32
    %c0_i32_0 = arith.constant 0 : i32
    %c0_i32_1 = arith.constant 0 : i32
    return %c0_i32, %c0_i32_0 : i32, i32
  }
  func.func @transform_9(%arg0: i32, %arg1: i32) -> (i32, i32) {
    %c0_i32 = arith.constant 0 : i32
    %c0_i32_0 = arith.constant 0 : i32
    %c0_i32_1 = arith.constant 0 : i32
    return %c0_i32, %c0_i32_0 : i32, i32
  }
  func.func @transform_10(%arg0: i32, %arg1: i32) -> i32 {
    %c0_i32 = arith.constant 0 : i32
    %c0_i32_0 = arith.constant 0 : i32
    return %c0_i32 : i32
  }
  func.func @transform_11(%arg0: i32, %arg1: i32) -> (i32, i32, i32) {
    %c0_i32 = arith.constant 0 : i32
    %c0_i32_0 = arith.constant 0 : i32
    return %arg0, %c0_i32, %arg1 : i32, i32, i32
  }
}

</mosaic_0001>

<bundles_post_ra>
// kernel: tpu_custom_call.1
= control target key start
LH: loop header
LB: loop body
LE: loop exit
PB: predicated region body
PF: predicated region fallthrough
CT: control target
= control target key end

     0   :  { %s2451_s0 = inlined_call_operand.vmem [shape: f32[2,4,256], index: 0, kind: input, shape index: {}]   ;;  %s2452_s1 = inlined_call_operand.vmem [shape: f32[2,4,256], index: 1, kind: input, shape index: {}]   ;;  %s2453_s2 = inlined_call_operand.vmem [shape: f32[8,4], index: 2, kind: input, shape index: {}]   ;;  %s2454_s3 = inlined_call_operand.vmem [shape: f32[8,1], index: 3, kind: input, shape index: {}]   ;;  %s2455_s4 = inlined_call_operand.vmem [shape: f32[16,32], index: 4, kind: input, shape index: {}]   ;;  %s2456_s5 = inlined_call_operand.vmem [shape: f32[8,32], index: 5, kind: input, shape index: {}]   ;;  %s2457_s6 = inlined_call_operand.vmem [shape: f32[4,8], index: 6, kind: input, shape index: {}]   ;;  %s2458_s7 = inlined_call_operand.vmem [shape: f32[4,1], index: 7, kind: input, shape index: {}]   ;;  %s2459_s8 = inlined_call_operand.vmem [shape: f32[4,1], index: 8, kind: input, shape index: {}]   ;;  %s2460_s9 = inlined_call_operand.vmem [shape: f32[4,1], index: 9, kind: input, shape index: {}]   ;;  %s2461_s10 = inlined_call_operand.<no memory space> [shape: f32[1], index: 10, kind: input, shape index: {}]   ;;  %s2462_s11 = inlined_call_operand.hbm [shape: f32[2,4,256], index: 11, kind: output, shape index: {}]  }
   0x1   :  { %2468 = sst [smem:[#allocation12_spill]] %s2454_s3 }
   0x2   :  { %16 = sst [smem:[#allocation2]] %s2461_s10 }
   0x3   :  { %17 = vsyncpa [#allocation4], 0 }
   0x4   :  { %19 = vsyncpa [#allocation4 + $0x1], 0  ;;  %s1959_s19 = smov 0   ;;  %s1961_s20 = smov 0  }
   0x5   :  { %s1963_s21 = smov 0   ;;  %s1965_s22 = smov 0  }
   0x6   :  { %s1967_s23 = smov 0   ;;  %s1969_s24 = smov 0  }
   0x7   :  { %s1971_s25 = smov 0   ;;  %s1973_s26 = smov 0  }
   0x8 LB: > { %2469 = sst [smem:[#allocation6_spill]] %s1868_s21  ;;  %s1479_s10 = sadd.s32 4294967295, %s1888_s26   ;;  %s1888_s26 = sphi %s1973_s26, %s25_s26   ;;  %s1884_s25 = sphi %s1971_s25, %s2483_s25   ;;  %s1880_s24 = sphi %s1969_s24, %s2482_s24   ;;  %s1876_s23 = sphi %s1967_s23, %s2481_s23   ;;  %s1872_s22 = sphi %s1965_s22, %s2480_s22   ;;  %s1868_s21 = sphi %s1963_s21, %s2479_s21   ;;  %s1864_s20 = sphi %s1961_s20, %s2485_s20   ;;  %s1860_s19 = sphi %s1959_s19, %s2484_s19  }
   0x9   : > { %2470 = sst [smem:[#allocation7_spill]] %s1880_s24  ;;  %s1480_s27 = sadd.s32 4294967294, %s1888_s26  }
   0xa   : > { %2471 = sst [smem:[#allocation8_spill]] %s1884_s25  ;;  %s34_s28 = sadd.s32 1, %s1880_s24 }
   0xb   : > { %p35_p0 = scmp.ge.s32.totalorder %s34_s28, 2  ;;  %s37_s29 = sadd.s32 1, %s1884_s25 }
   0xc   : > { %p299_p1 = scmp.ne.s32.totalorder %s1868_s21, %s1864_s20  ;;  %p300_p2 = scmp.eq.s32.totalorder %s1479_s10, 3 }
   0xd   : > { %s2487_s28 = smov (%p35_p0, %s34_s28), 0  ;;  %s2489_s29 = smov (!%p35_p0, %s37_s29), %s1884_s25 }
   0xe   : > { %2472 = sst [smem:[#allocation9_spill]] %s2487_s28  ;;  %s285_s30 = ssub.s32 %s1880_s24, %s2487_s28 }
   0xf   : > { %p2010_p3 = por %p300_p2, %p299_p1  ;;  %p39_p4 = scmp.ge.s32.totalorder %s2489_s29, 2 }
  0x10   : > { %p305_p5 = scmp.ne.s32.totalorder %s1864_s20, %s1860_s19  ;;  %p306_p6 = scmp.eq.s32.totalorder %s1480_s27, 3 }
  0x11   : > { %p1483_p7 = scmp.ge.s32.totalorder %s1888_s26, 1  ;;  %s2491_s29 = smov (%p39_p4, %s2489_s29), 0 }
  0x12   : > { %2474 = sst [smem:[#allocation10_spill]] %s2491_s29  ;;  %p2019_p8 = por %p306_p6, %p305_p5 }
  0x13   : > { %p370_p9 = scmp.lt.s32.totalorder %s1888_s26, 5  ;;  %s284_s14 = ssub.s32 %s1884_s25, %s2491_s29 }
  0x14   : > { %s289_s15 = sadd.s32 1, %s1868_s21  ;;  %s286_s16 = sor.u32 %s285_s30, %s284_s14 }
  0x15   : > { %p371_p10 = pnand %p1483_p7, %p370_p9  ;;  %p287_p11 = scmp.eq.s32.totalorder %s286_s16, 0 }
  0x16   : > { %p418_p12 = scmp.lt.s32.totalorder (!%p371_p10), %s1876_s23, 1  ;;  %p425_p13 = scmp.lt.s32.totalorder (!%p371_p10), %s1872_s22, 1  ;;  %v1890_v0 = vmov (!%p371_p10), 0.0   ;;  %v1891_v2 = vmov (!%p371_p10), 0   ;;  %vm447_vm0 = vcmask (!%p371_p10), 1043456   ;;  %v434_v5 = vld [vmem:[%s2453_s2] sm:$0xff] (!%p371_p10) }
  0x17   : > { %s2028_s17 = scalar_select %p287_p11, %s1868_s21, %s289_s15  }
  0x18   : > { %374 = sbr.rel (%p371_p10) target bundleno = 1465 (0x5b9), region = 64  ;;  %516 = vmatprep.mubr.f32.mxu0 (!%p371_p10), %v1890_v0  ;;  %s2477_s3 = sld [smem:[#allocation12_spill]] (!%p371_p10)  ;;  %1717 = vset.pattern.permute.xlu0 (!%p371_p10), %v1891_v2  ;;  %vm443_vm1 = vcmask (!%p371_p10), 31744   ;;  %vm1892_vm2 = vmmov (!%p371_p10), 0   ;;  %v1893_v18 = vmov (!%p371_p10), 1.0   ;;  %v614_v37 = vld [vmem:[%s2455_s4] sm:$0xff] (!%p371_p10) }
  0x19   : > { %2476 = sst [smem:[#allocation11_spill]] %s2028_s17  ;;  %vm616_vm3 = vcmask (!%p371_p10), 261120   ;;  %v1894_v38 = vmov (!%p371_p10), 0.0|0.0   ;;  %v615_v41 = vld [vmem:[%s2455_s4 + $0x8] sm:$0xff] (!%p371_p10)  ;;  %v700_v43 = vld [vmem:[%s2456_s5] sm:$0xff] (!%p371_p10)  ;;  %vm809_vm4 = vcmask (!%p371_p10), 64512  }
  0x1a   : > { %v1358_v55 = vld [vmem:[%s2459_s8] sm:$0xf] (!%p371_p10)  ;;  %s415_s21 = sand.u32 (!%p371_p10), 1, %s1864_s20   ;;  %s1895_s16 = smov (!%p371_p10), [#allocation3]  }
  0x1b   : > { %s1798_s18 = sshll.u32 (!%p371_p10), %s1895_s16, 4  ;;  %s1799_s18 = int_to_ptr.vmem [resolvable:$false] %s1798_s18 }
  0x1e   : > { %v435_v1 = vld [vmem:[%s2477_s3] sm:$0xff] (!%p371_p10)  ;;  %s1332_s3 = sld [smem:[#allocation2]] (!%p371_p10) }
  0x1f   : > { %s419_s27 = scalar_select %p418_p12, %s1876_s23, 1  ;;  %438 = vperm.xlu0 %1717, %v435_v1  }
  0x20   : > { %s426_s30 = scalar_select %p425_p13, %s1872_s22, 1 }
  0x21   : > { %s1522_s14 = sshll.u32 %s419_s27, 3  ;;  %s1487_s15 = sshll.u32 %s419_s27, 1 }
  0x22   : > { %s422_s28 = scalar_lea.vmem %s2451_s0, %s1522_s14  ;;  %s428_s25 = sadd.s32 %s1487_s15, %s426_s30 }
  0x23   : > { %v432_v3 = vld [vmem:[%s422_s28] sm:$0xff]  ;;  %s1488_s24 = sshll.u32 %s428_s25, 2  ;;  %s1518_s25 = sshll.u32 %s1876_s23, 1 }
  0x24   : > { %v442_v4 = vcombine.high %v432_v3, %v432_v3  ;;  %s430_s10 = scalar_lea.vmem %s2452_s1, %s1488_s24  ;;  %s1484_s24 = sshll.u32 %s415_s21, 2 }
  0x25   : > { %v2049_v6 = vld [vmem:[%s430_s10] sm:$0xf]  ;;  %s1385_s28 = sadd.s32 %s1872_s22, %s1518_s25  ;;  %s417_s17 = scalar_lea.vmem [#allocation3], %s1484_s24 }
  0x26   : > { %1489 = vmatprep.subr.msk.mxu0 %vm447_vm0, %v442_v4  ;;  %s1519_s29 = sshll.u32 %s1385_s28, 6  ;;  %s1389_s27 = sshll.u32 %s417_s17, 4  ;;  %s2400_s27 = int_to_ptr.vmem [resolvable:$true] %s1389_s27 }
  0x27   : > { %1490 = vmatpush1.msk.msra.mxu0 %vm447_vm0, %v432_v3  ;;  %s2398_s15 = scalar_lea.hbm %s2462_s11, %s1519_s29  ;;  %s1374_s22 = scalar_lea.sflag [#allocation4], %s415_s21 }
  0x28   : > { %1491 = vmatmul.mubr.msk.f32.vlgmr.msra.gmra.mrb[0].mxu0 %vm443_vm1, %v434_v5  ;;  %1571 = vmatprep.subr.mxu0 %v1890_v0  ;;  %s1794_s23 = scalar_lea.vmem %s2400_s27, 64  ;;  %s1800_s10 = scalar_lea.vmem %s1799_s18, 128 }
  0x29   : > { %1572 = vmatpush3.msk.msra.mxu0 %vm447_vm0, %v2049_v6  ;;  %1573 = vmatprep.mubr.msk.f32.mxu0 %vm1892_vm2, %v1890_v0  ;;  %p1795_p0 = scmp.ne.s32.totalorder %s2400_s27, %s1794_s23  ;;  %p1801_p4 = scmp.lt.s32.totalorder %s2400_s27, %s1799_s18 }
  0x2a   : > { %p1802_p5 = scmp.lt.s32.totalorder %s1800_s10, %s1794_s23 }
  0x2b   : > { %p1796_p1 = pnand %p1795_p0, %p2010_p3 }
  0x2c   : > { %1574 = vmatmul.mubr.msk.f32.vlgmr.msra.gmra.mrb[2].mxu0 %vm443_vm1, %v434_v5  ;;  %p1803_p6 = por %p1802_p5, %p1801_p4 }
  0x2d   : > { %687 = vmatprep.mubr.f32.mxu0 %v1890_v0  ;;  %p1797_p2 = pneg %p1796_p1 }
  0x2f   : > { %p1804_p7 = pnand %p1803_p6, %p1797_p2 }
  0x9e   : > { %v439_v7 = vpop.permute.xlu0 %438 }
  0xfb   : > { %v518_v8 = vpop.f32.mrb[0].mxu0 }
  0xfc   : > { %v519_v9 = vadd.f32 %v518_v8, %v439_v7  ;;  %v520_v10 = vpop.f32.mrb[1].mxu0 }
  0xfd   : > { %v521_v11 = vadd.f32 %v520_v10, %v439_v7 }
  0xfe   : > { %1720 = vtanh.f32 %v519_v9 }
  0xff   : > { %1722 = vtanh.f32 %v521_v11  ;;  %v604_v12 = vpop.f32.mrb[2].mxu0 }
 0x100   : > { %v605_v13 = vadd.f32 %v604_v12, %v439_v7  ;;  %v1575_v14 = vpop.f32.mrb[3].mxu0 }
 0x102   : > { %1724 = vtanh.f32 %v605_v13 }
 0x108   : > { %v1721_v15 = vpop.eup %1720 }
 0x109   : > { %v1723_v16 = vpop.eup %1722  ;;  %v525_v17 = vmul.f32 2.0, %v1721_v15  ;;  %v1628_v21 = vpack.c.bf16 %v1721_v15, %v1893_v18 }
 0x10a   : > { %v1626_v19 = vpack.c.bf16 %v1723_v16, %v1893_v18  ;;  %v526_v20 = vmul.f32 2.0, %v1723_v16 }
 0x10b   : > { %v527_v22 = vmul.f32 %v1721_v15, %v525_v17 }
 0x10c   : > { %v1725_v23 = vpop.eup %1724  ;;  %1627 = vmatprep.subr.bf16.mxu0 %v1626_v19  ;;  %v528_v24 = vmul.f32 %v1723_v16, %v526_v20 }
 0x10d   : > { %1629 = vmatpush1.bf16.msra.mxu0 %v1628_v21  ;;  %v1492_v25 = vadd.f32 -1.0, %v527_v22  ;;  %v609_v26 = vmul.f32 2.0, %v1725_v23  ;;  %v1635_v39 = vpack.c.bf16 %v1725_v23, %v1893_v18 }
 0x10e   : > { %v1493_v27 = vadd.f32 -1.0, %v528_v24 }
 0x10f   : > { %v531_v28 = vmul.f32 %v1492_v25, %v525_v17  ;;  %v610_v29 = vmul.f32 %v1725_v23, %v609_v26 }
 0x110   : > { %v532_v30 = vmul.f32 %v1493_v27, %v526_v20 }
 0x111   : > { %v533_v31 = vsub.f32 %v531_v28, %v1721_v15  ;;  %v1496_v32 = vadd.f32 -1.0, %v610_v29 }
 0x112   : > { %v534_v33 = vsub.f32 %v532_v30, %v1723_v16 }
 0x113   : > { %v1632_v35 = vpack.c.bf16 %v533_v31, %v1492_v25  ;;  %v612_v36 = vmul.f32 %v1496_v32, %v609_v26 }
 0x114   : > { %v1630_v34 = vpack.c.bf16 %v534_v33, %v1493_v27 }
 0x115   : > { %v613_v40 = vsub.f32 %v612_v36, %v1725_v23 }
 0x116   : > { %1631 = vmatprep.subr.bf16.mxu0 %v1630_v34 }
 0x117   : > { %1633 = vmatpush1.bf16.msra.mxu0 %v1632_v35  ;;  %v1638_v42 = vpack.c.bf16 %v613_v40, %v1496_v32 }
 0x118   : > { %1634 = vmatprep.subr.bf16.mxu0 %v1894_v38 }
 0x11a   : > { %1497 = vmatmul.mubr.msk.f32.vlgmr.msra.gmra.mrb[4].mxu0 %vm616_vm3, %v614_v37 }
 0x11b   : > { %1636 = vmatpush3.bf16.msra.mxu0 %v1635_v39  ;;  %693 = vmatprep.mubr.f32.mxu0 %v1890_v0 }
 0x11c   : > { %1637 = vmatprep.subr.bf16.mxu0 %v1894_v38 }
 0x11e   : > { %1498 = vmatmul.mubr.msk.f32.gmra.mrb[6].mxu0 %vm616_vm3, %v615_v41 }
 0x11f   : > { %1639 = vmatpush3.bf16.msra.mxu0 %v1638_v42  ;;  %1584 = vmatprep.mubr.msk.f32.mxu0 %vm1892_vm2, %v1890_v0 }
 0x122   : > { %1585 = vmatmul.mubr.msk.f32.vlgmr.msra.gmra.mrb[8].mxu0 %vm616_vm3, %v700_v43 }
 0x1ed   : > { %v689_v44 = vpop.f32.mrb[4].mxu0 }
 0x1ee   : > { %v774_v45 = vpack.c.bf16 %v689_v44, %v689_v44  ;;  %v691_v46 = vpop.f32.mrb[5].mxu0 }
 0x1ef   : > { %v775_v47 = vpack.c.bf16 %v691_v46, %v691_v46 }
 0x1f0   : > { %777 = vxpose.xlu0.c.b16.start.end [1/1] (short) %v774_v45, 128 }
 0x1f1   : > { %793 = vxpose.xlu1.c.b16.start.end [1/1] (short) %v775_v47, 128  ;;  %v2070_v48 = vpop.f32.mrb[6].mxu0 }
 0x1f2   : > { %v697_v49 = vpop.f32.mrb[7].mxu0 }
 0x1f3   : > { %v1193_v50 = vpack.c.bf16 %v697_v49, %v697_v49 }
 0x1f5   : > { %v770_v51 = vpop.f32.mrb[8].mxu0  ;;  %1242 = vmatprep.mubr.bf16.mxu0 %v1193_v50  ;;  %1718 = vset.pattern.permute.xlu1 %v1891_v2 }
 0x1f6   : > { %v776_v52 = vpack.c.bf16 %v770_v51, %v770_v51  ;;  %v1586_v53 = vpop.f32.mrb[9].mxu0 }
 0x1f8   : > { %1640 = vmatprep.subr.msk.bf16.mxu1 %vm447_vm0, %v776_v52  ;;  %v859_v54 = vsel %vm447_vm0, %v776_v52, 0 }
 0x1f9   : > { %1588 = vmatpush3.bf16.msra.mxu1 %v859_v54 }
 0x215   : > { %1361 = vperm.xlu0 %1717, %v1358_v55  }
 0x256   : > { %v785_v56 = vpop.trf.xlu0 }
 0x257   : > { %1589 = vmatprep.mubr.msk.bf16.mxu1 %vm809_vm4, %v785_v56  ;;  %v801_v60 = vpop.trf.xlu1 }
 0x25a   : > { %v786_v57 = vpop.trf.xlu0 }
 0x25b   : > { %1590 = vmatmul.mubr.msk.bf16.vlgmr.msra.gmra.mrb[0].mxu1 %vm809_vm4, %v786_v57  ;;  %v802_v63 = vpop.trf.xlu1 }
 0x25e   : > { %v787_v58 = vpop.trf.xlu0 }
 0x25f   : > { %1593 = vmatprep.mubr.msk.bf16.mxu1 %vm809_vm4, %v787_v58  ;;  %v803_v2 = vpop.trf.xlu1 }
 0x262   : > { %v788_v59 = vpop.trf.xlu0 }
 0x263   : > { %1594 = vmatmul.mubr.msk.bf16.gmra.mrb[4].mxu1 %vm809_vm4, %v788_v59  ;;  %v804_v4 = vpop.trf.xlu1 }
 0x266   : > { %v789_v61 = vpop.trf.xlu0 }
 0x267   : > { %1597 = vmatprep.mubr.msk.bf16.mxu1 %vm809_vm4, %v789_v61  ;;  %v805_v5 = vpop.trf.xlu1 }
 0x26a   : > { %v790_v62 = vpop.trf.xlu0 }
 0x26b   : > { %1598 = vmatmul.mubr.msk.bf16.gmra.mrb[8].mxu1 %vm809_vm4, %v790_v62  ;;  %v806_v7 = vpop.trf.xlu1 }
 0x26e   : > { %v791_v1 = vpop.trf.xlu0 }
 0x26f   : > { %1601 = vmatprep.mubr.msk.bf16.mxu1 %vm809_vm4, %v791_v1  ;;  %v807_v8 = vpop.trf.xlu1 }
 0x272   : > { %v792_v3 = vpop.trf.xlu0 }
 0x273   : > { %1602 = vmatmul.mubr.msk.bf16.gmra.mrb[12].mxu1 %vm809_vm4, %v792_v3  ;;  %v808_v9 = vpop.trf.xlu1 }
 0x274   : > { %1605 = vmatprep.mubr.msk.bf16.mxu1 %vm809_vm4, %v801_v60 }
 0x27b   : > { %1606 = vmatmul.mubr.msk.bf16.gmra.mrb[16].mxu1 %vm809_vm4, %v802_v63 }
 0x27c   : > { %1609 = vmatprep.mubr.msk.bf16.mxu1 %vm809_vm4, %v803_v2 }
 0x283   : > { %1610 = vmatmul.mubr.msk.bf16.gmra.mrb[20].mxu1 %vm809_vm4, %v804_v4 }
 0x284   : > { %1613 = vmatprep.mubr.msk.bf16.mxu1 %vm809_vm4, %v805_v5 }
 0x28b   : > { %1614 = vmatmul.mubr.msk.bf16.gmra.mrb[24].mxu1 %vm809_vm4, %v806_v7 }
 0x28c   : > { %1617 = vmatprep.mubr.msk.bf16.mxu1 %vm809_vm4, %v807_v8 }
 0x293   : > { %1618 = vmatmul.mubr.msk.bf16.gmra.mrb[28].mxu1 %vm809_vm4, %v808_v9 }
 0x32e   : > { %v2094_v10 = vpop.f32.mrb[0].mxu1 }
 0x32f   : > { %v2096_v11 = vpop.f32.mrb[1].mxu1 }
 0x330   : > { %v2098_v12 = vpop.f32.mrb[2].mxu1 }
 0x331   : > { %v2100_v13 = vpop.f32.mrb[3].mxu1 }
 0x336   : > { %v2102_v14 = vpop.f32.mrb[4].mxu1 }
 0x337   : > { %v1024_v15 = vmax.f32 %v2094_v10, %v2102_v14  ;;  %v2106_v16 = vpop.f32.mrb[5].mxu1 }
 0x338   : > { %v1022_v17 = vmax.f32 %v2096_v11, %v2106_v16  ;;  %v2110_v18 = vpop.f32.mrb[6].mxu1 }
 0x339   : > { %v1025_v19 = vmax.f32 %v2098_v12, %v2110_v18  ;;  %v2114_v20 = vpop.f32.mrb[7].mxu1 }
 0x33a   : > { %v1023_v21 = vmax.f32 %v2100_v13, %v2114_v20 }
 0x33e   : > { %v2118_v22 = vpop.f32.mrb[8].mxu1 }
 0x33f   : > { %v1028_v23 = vmax.f32 %v1024_v15, %v2118_v22  ;;  %v2121_v24 = vpop.f32.mrb[9].mxu1 }
 0x340   : > { %v1026_v25 = vmax.f32 %v1022_v17, %v2121_v24  ;;  %v2124_v26 = vpop.f32.mrb[10].mxu1 }
 0x341   : > { %v1029_v27 = vmax.f32 %v1025_v19, %v2124_v26  ;;  %v2127_v28 = vpop.f32.mrb[11].mxu1 }
 0x342   : > { %v1027_v29 = vmax.f32 %v1023_v21, %v2127_v28 }
 0x346   : > { %v2130_v30 = vpop.f32.mrb[12].mxu1 }
 0x347   : > { %v1032_v31 = vmax.f32 %v1028_v23, %v2130_v30  ;;  %v2133_v32 = vpop.f32.mrb[13].mxu1 }
 0x348   : > { %v1030_v33 = vmax.f32 %v1026_v25, %v2133_v32  ;;  %v2136_v34 = vpop.f32.mrb[14].mxu1 }
 0x349   : > { %v1033_v35 = vmax.f32 %v1029_v27, %v2136_v34  ;;  %v2139_v36 = vpop.f32.mrb[15].mxu1 }
 0x34a   : > { %v1031_v37 = vmax.f32 %v1027_v29, %v2139_v36 }
 0x34e   : > { %v2142_v38 = vpop.f32.mrb[16].mxu1 }
 0x34f   : > { %v1036_v39 = vmax.f32 %v1032_v31, %v2142_v38  ;;  %v2145_v40 = vpop.f32.mrb[17].mxu1 }
 0x350   : > { %v1034_v41 = vmax.f32 %v1030_v33, %v2145_v40  ;;  %v2148_v42 = vpop.f32.mrb[18].mxu1 }
 0x351   : > { %v1037_v43 = vmax.f32 %v1033_v35, %v2148_v42  ;;  %v2151_v44 = vpop.f32.mrb[19].mxu1 }
 0x352   : > { %v1035_v45 = vmax.f32 %v1031_v37, %v2151_v44 }
 0x356   : > { %v2154_v46 = vpop.f32.mrb[20].mxu1 }
 0x357   : > { %v1040_v47 = vmax.f32 %v1036_v39, %v2154_v46  ;;  %v2157_v49 = vpop.f32.mrb[21].mxu1 }
 0x358   : > { %v1038_v50 = vmax.f32 %v1034_v41, %v2157_v49  ;;  %v2160_v51 = vpop.f32.mrb[22].mxu1 }
 0x359   : > { %v1041_v52 = vmax.f32 %v1037_v43, %v2160_v51  ;;  %v2163_v53 = vpop.f32.mrb[23].mxu1 }
 0x35a   : > { %v1039_v54 = vmax.f32 %v1035_v45, %v2163_v53 }
 0x35e   : > { %v2166_v55 = vpop.f32.mrb[24].mxu1 }
 0x35f   : > { %v1044_v56 = vmax.f32 %v1040_v47, %v2166_v55  ;;  %v2169_v57 = vpop.f32.mrb[25].mxu1 }
 0x360   : > { %v1042_v58 = vmax.f32 %v1038_v50, %v2169_v57  ;;  %v2172_v59 = vpop.f32.mrb[26].mxu1 }
 0x361   : > { %v1045_v60 = vmax.f32 %v1041_v52, %v2172_v59  ;;  %v2175_v61 = vpop.f32.mrb[27].mxu1 }
 0x362   : > { %v1043_v62 = vmax.f32 %v1039_v54, %v2175_v61 }
 0x366   : > { %v2178_v63 = vpop.f32.mrb[28].mxu1 }
 0x367   : > { %v1048_v1 = vmax.f32 %v1044_v56, %v2178_v63  ;;  %v2181_v2 = vpop.f32.mrb[29].mxu1 }
 0x368   : > { %v1046_v3 = vmax.f32 %v1042_v58, %v2181_v2  ;;  %v2184_v4 = vpop.f32.mrb[30].mxu1 }
 0x369   : > { %v1049_v5 = vmax.f32 %v1045_v60, %v2184_v4  ;;  %v2187_v7 = vpop.f32.mrb[31].mxu1 }
 0x36a   : > { %v1047_v8 = vmax.f32 %v1043_v62, %v2187_v7 }
 0x36b   : > { %v1051_v9 = vmax.f32 %v1048_v1, %v1049_v5 }
 0x36c   : > { %v1050_v15 = vmax.f32 %v1046_v3, %v1047_v8 }
 0x36e   : > { %v1052_v17 = vmax.f32 %v1050_v15, %v1051_v9 }
 0x370   : > { %v1053_v19 = vrot.slane %v1052_v17, 4 }
 0x372   : > { %v1054_v21 = vmax.f32 %v1052_v17, %v1053_v19 }
 0x374   : > { %v1055_v23 = vrot.slane %v1054_v21, 2 }
 0x376   : > { %v1056_v25 = vmax.f32 %v1054_v21, %v1055_v23 }
 0x378   : > { %v1057_v27 = vrot.slane %v1056_v25, 1 }
 0x37a   : > { %v2190_v29 = vmax.f32 %v1056_v25, %v1057_v27 }
 0x37c   : > { %v1059_v31 = vsub.f32 %v2096_v11, %v2190_v29  ;;  %v1060_v33 = vsub.f32 %v2100_v13, %v2190_v29  ;;  %v1061_v35 = vsub.f32 %v2094_v10, %v2190_v29  ;;  %v1062_v37 = vsub.f32 %v2098_v12, %v2190_v29 }
 0x37d   : > { %v1063_v39 = vsub.f32 %v2106_v16, %v2190_v29  ;;  %v1064_v41 = vsub.f32 %v2114_v20, %v2190_v29  ;;  %v1065_v43 = vsub.f32 %v2102_v14, %v2190_v29  ;;  %v1066_v11 = vsub.f32 %v2110_v18, %v2190_v29 }
 0x37e   : > { %v1067_v13 = vsub.f32 %v2121_v24, %v2190_v29  ;;  %v1068_v10 = vsub.f32 %v2127_v28, %v2190_v29  ;;  %v1069_v12 = vsub.f32 %v2118_v22, %v2190_v29  ;;  %v1070_v16 = vsub.f32 %v2124_v26, %v2190_v29 }
 0x37f   : > { %v1071_v20 = vsub.f32 %v2133_v32, %v2190_v29  ;;  %v1072_v14 = vsub.f32 %v2139_v36, %v2190_v29  ;;  %v1073_v18 = vsub.f32 %v2130_v30, %v2190_v29  ;;  %v1074_v24 = vsub.f32 %v2136_v34, %v2190_v29 }
 0x380   : > { %v1075_v28 = vsub.f32 %v2145_v40, %v2190_v29  ;;  %v1076_v22 = vsub.f32 %v2151_v44, %v2190_v29  ;;  %v1077_v26 = vsub.f32 %v2142_v38, %v2190_v29  ;;  %v1078_v32 = vsub.f32 %v2148_v42, %v2190_v29 }
 0x381   : > { %v1079_v36 = vsub.f32 %v2157_v49, %v2190_v29  ;;  %v1080_v30 = vsub.f32 %v2163_v53, %v2190_v29  ;;  %v1081_v34 = vsub.f32 %v2154_v46, %v2190_v29  ;;  %v1082_v40 = vsub.f32 %v2160_v51, %v2190_v29 }
 0x382   : > { %v1083_v44 = vsub.f32 %v2169_v57, %v2190_v29  ;;  %v1084_v38 = vsub.f32 %v2175_v61, %v2190_v29  ;;  %v1085_v42 = vsub.f32 %v2166_v55, %v2190_v29  ;;  %v1086_v45 = vsub.f32 %v2172_v59, %v2190_v29 }
 0x383   : > { %v1087_v47 = vsub.f32 %v2181_v2, %v2190_v29  ;;  %v1088_v49 = vsub.f32 %v2187_v7, %v2190_v29  ;;  %v1089_v50 = vsub.f32 %v2178_v63, %v2190_v29  ;;  %v1090_v52 = vsub.f32 %v2184_v4, %v2190_v29 }
 0x384   : > { %v1091_v54 = vmul.f32 1.442695, %v1059_v31  ;;  %v1093_v56 = vmul.f32 1.442695, %v1060_v33  ;;  %v1095_v58 = vmul.f32 1.442695, %v1061_v35 }
 0x385   : > { %v1097_v60 = vmul.f32 1.442695, %v1062_v37  ;;  %v1099_v62 = vmul.f32 1.442695, %v1063_v39  ;;  %v1101_v1 = vmul.f32 1.442695, %v1064_v41 }
 0x386   : > { %1726 = vpow2.f32 %v1091_v54  ;;  %v1103_v3 = vmul.f32 1.442695, %v1065_v43  ;;  %v1105_v5 = vmul.f32 1.442695, %v1066_v11  ;;  %v1107_v8 = vmul.f32 1.442695, %v1067_v13 }
 0x387   : > { %1728 = vpow2.f32 %v1093_v56  ;;  %v1109_v9 = vmul.f32 1.442695, %v1068_v10  ;;  %v1111_v15 = vmul.f32 1.442695, %v1069_v12  ;;  %v1113_v17 = vmul.f32 1.442695, %v1070_v16 }
 0x388   : > { %1730 = vpow2.f32 %v1095_v58  ;;  %v1115_v19 = vmul.f32 1.442695, %v1071_v20  ;;  %v1117_v21 = vmul.f32 1.442695, %v1072_v14  ;;  %v1119_v25 = vmul.f32 1.442695, %v1073_v18 }
 0x389   : > { %1732 = vpow2.f32 %v1097_v60  ;;  %v1121_v31 = vmul.f32 1.442695, %v1074_v24  ;;  %v1123_v35 = vmul.f32 1.442695, %v1075_v28  ;;  %v1125_v43 = vmul.f32 1.442695, %v1076_v22 }
 0x38a   : > { %1734 = vpow2.f32 %v1099_v62  ;;  %v1127_v13 = vmul.f32 1.442695, %v1077_v26  ;;  %v1129_v20 = vmul.f32 1.442695, %v1078_v32  ;;  %v1131_v18 = vmul.f32 1.442695, %v1079_v36 }
 0x38b   : > { %1736 = vpow2.f32 %v1101_v1  ;;  %v1133_v26 = vmul.f32 1.442695, %v1080_v30  ;;  %v1135_v32 = vmul.f32 1.442695, %v1081_v34  ;;  %v1137_v53 = vmul.f32 1.442695, %v1082_v40 }
 0x38c   : > { %1738 = vpow2.f32 %v1103_v3  ;;  %v1139_v46 = vmul.f32 1.442695, %v1083_v44  ;;  %v1141_v51 = vmul.f32 1.442695, %v1084_v38  ;;  %v1143_v57 = vmul.f32 1.442695, %v1085_v42 }
 0x38d   : > { %1740 = vpow2.f32 %v1105_v5  ;;  %v1145_v61 = vmul.f32 1.442695, %v1086_v45  ;;  %v1147_v55 = vmul.f32 1.442695, %v1087_v47  ;;  %v1149_v59 = vmul.f32 1.442695, %v1088_v49 }
 0x38e   : > { %1742 = vpow2.f32 %v1107_v8 }
 0x38f   : > { %1744 = vpow2.f32 %v1109_v9  ;;  %v1151_v9 = vmul.f32 1.442695, %v1089_v50 }
 0x390   : > { %v2256_v23 = vpop.eup %1726  ;;  %1746 = vpow2.f32 %v1111_v15 }
 0x391   : > { %v2258_v27 = vpop.eup %1728  ;;  %1748 = vpow2.f32 %v1113_v17  ;;  %v1153_v17 = vmul.f32 1.442695, %v1090_v52 }
 0x392   : > { %v2260_v33 = vpop.eup %1730  ;;  %1750 = vpow2.f32 %v1115_v19  ;;  %v1155_v37 = vadd.f32 %v2258_v27, %v2256_v23  ;;  %v1194_v39 = vpack.c.bf16 %v2258_v27, %v2256_v23 }
 0x393   : > { %v2266_v41 = vpop.eup %1732  ;;  %1752 = vpow2.f32 %v1117_v21 }
 0x394   : > { %v2268_v11 = vpop.eup %1734  ;;  %1754 = vpow2.f32 %v1119_v25  ;;  %v1156_v10 = vadd.f32 %v2260_v33, %v1155_v37  ;;  %v1195_v12 = vpack.c.bf16 %v2266_v41, %v2260_v33 }
 0x395   : > { %v2273_v16 = vpop.eup %1736  ;;  %1756 = vpow2.f32 %v1121_v31 }
 0x396   : > { %v2275_v14 = vpop.eup %1738  ;;  %1758 = vpow2.f32 %v1123_v35  ;;  %v1157_v24 = vadd.f32 %v2266_v41, %v1156_v10  ;;  %v1196_v28 = vpack.c.bf16 %v2273_v16, %v2268_v11 }
 0x397   : > { %v2280_v22 = vpop.eup %1740  ;;  %1760 = vpow2.f32 %v1125_v43 }
 0x398   : > { %v2285_v54 = vpop.eup %1742  ;;  %1762 = vpow2.f32 %v1127_v13  ;;  %v1158_v36 = vadd.f32 %v2268_v11, %v1157_v24  ;;  %v1197_v56 = vpack.c.bf16 %v2280_v22, %v2275_v14 }
 0x399   : > { %v2293_v58 = vpop.eup %1744  ;;  %1764 = vpow2.f32 %v1129_v20 }
 0x39a   : > { %v2298_v30 = vpop.eup %1746  ;;  %1766 = vpow2.f32 %v1131_v18  ;;  %v1159_v34 = vadd.f32 %v2273_v16, %v1158_v36  ;;  %v1198_v60 = vpack.c.bf16 %v2293_v58, %v2285_v54 }
 0x39b   : > { %v2306_v62 = vpop.eup %1748  ;;  %1768 = vpow2.f32 %v1133_v26 }
 0x39c   : > { %v2311_v40 = vpop.eup %1750  ;;  %1770 = vpow2.f32 %v1135_v32  ;;  %v1160_v44 = vadd.f32 %v2275_v14, %v1159_v34  ;;  %v1199_v1 = vpack.c.bf16 %v2306_v62, %v2298_v30 }
 0x39d   : > { %v2319_v3 = vpop.eup %1752  ;;  %1772 = vpow2.f32 %v1137_v53 }
 0x39e   : > { %v2324_v38 = vpop.eup %1754  ;;  %1774 = vpow2.f32 %v1139_v46  ;;  %v1161_v42 = vadd.f32 %v2280_v22, %v1160_v44  ;;  %v1200_v5 = vpack.c.bf16 %v2319_v3, %v2311_v40 }
 0x39f   : > { %v2332_v8 = vpop.eup %1756  ;;  %1776 = vpow2.f32 %v1141_v51 }
 0x3a0   : > { %v1759_v45 = vpop.eup %1758  ;;  %1778 = vpow2.f32 %v1143_v57  ;;  %v1162_v2 = vadd.f32 %v2285_v54, %v1161_v42  ;;  %v1201_v47 = vpack.c.bf16 %v2332_v8, %v2324_v38  ;;  %v1192_v54 = vpack.c.bf16 %v2070_v48, %v2070_v48  ;;  %v1365_v48 = vld [vmem:[%s2460_s9] sm:$0xf] }
 0x3a1   : > { %v1761_v15 = vpop.eup %1760  ;;  %1780 = vpow2.f32 %v1145_v61 }
 0x3a2   : > { %v1763_v19 = vpop.eup %1762  ;;  %1782 = vpow2.f32 %v1147_v55  ;;  %v1163_v7 = vadd.f32 %v2293_v58, %v1162_v2  ;;  %v1202_v49 = vpack.c.bf16 %v1761_v15, %v1759_v45 }
 0x3a3   : > { %v1765_v21 = vpop.eup %1764  ;;  %1784 = vpow2.f32 %v1149_v59 }
 0x3a4   : > { %v1767_v63 = vpop.eup %1766  ;;  %1786 = vpow2.f32 %v1151_v9  ;;  %v1164_v50 = vadd.f32 %v2298_v30, %v1163_v7  ;;  %1547 = vmatprep.subr.bf16.mxu0 %v1202_v49  ;;  %v1203_v25 = vpack.c.bf16 %v1765_v21, %v1763_v19 }
 0x3a5   : > { %v1769_v31 = vpop.eup %1768  ;;  %1788 = vpow2.f32 %v1153_v17  ;;  %1548 = vmatpush3.bf16.msra.mxu0 %v1194_v39  ;;  %v1333_v17 = vstv %s1332_s3 }
 0x3a6   : > { %v1771_v4 = vpop.eup %1770  ;;  %v1165_v29 = vadd.f32 %v2306_v62, %v1164_v50  ;;  %1549 = vmatprep.subr.bf16.mxu0 %v1203_v25  ;;  %v1204_v52 = vpack.c.bf16 %v1769_v31, %v1767_v63 }
 0x3a7   : > { %v1773_v35 = vpop.eup %1772 }
 0x3a8   : > { %v1775_v37 = vpop.eup %1774  ;;  %v1166_v43 = vadd.f32 %v2311_v40, %v1165_v29  ;;  %v1205_v13 = vpack.c.bf16 %v1773_v35, %v1771_v4 }
 0x3a9   : > { %v1777_v10 = vpop.eup %1776  ;;  %1550 = vmatpush3.bf16.msra.mxu0 %v1195_v12 }
 0x3aa   : > { %v1779_v20 = vpop.eup %1778  ;;  %v1167_v18 = vadd.f32 %v2319_v3, %v1166_v43  ;;  %1551 = vmatprep.subr.bf16.mxu0 %v1204_v52  ;;  %v1206_v23 = vpack.c.bf16 %v1777_v10, %v1775_v37 }
 0x3ab   : > { %v1781_v27 = vpop.eup %1780 }
 0x3ac   : > { %v1783_v39 = vpop.eup %1782  ;;  %v1168_v24 = vadd.f32 %v2324_v38, %v1167_v18  ;;  %v1207_v26 = vpack.c.bf16 %v1781_v27, %v1779_v20 }
 0x3ad   : > { %v1785_v32 = vpop.eup %1784  ;;  %1552 = vmatpush3.bf16.msra.mxu0 %v1196_v28 }
 0x3ae   : > { %v1787_v36 = vpop.eup %1786  ;;  %v1169_v53 = vadd.f32 %v2332_v8, %v1168_v24  ;;  %1553 = vmatprep.subr.bf16.mxu0 %v1205_v13  ;;  %v1208_v33 = vpack.c.bf16 %v1785_v32, %v1783_v39 }
 0x3af   : > { %v1789_v41 = vpop.eup %1788 }
 0x3b0   : > { %v1170_v12 = vadd.f32 %v1759_v45, %v1169_v53  ;;  %v1209_v46 = vpack.c.bf16 %v1789_v41, %v1787_v36 }
 0x3b1   : > { %1554 = vmatpush3.bf16.msra.mxu0 %v1197_v56 }
 0x3b2   : > { %v1171_v34 = vadd.f32 %v1761_v15, %v1170_v12  ;;  %1555 = vmatprep.subr.bf16.mxu0 %v1206_v23  ;;  %v1252_v15 = vld [vmem:[%s2457_s6] sm:$0xf] }
 0x3b4   : > { %v1172_v51 = vadd.f32 %v1763_v19, %v1171_v34  ;;  %v1334_v19 = vmul.f32 %v1333_v17, %v2049_v6 }
 0x3b5   : > { %1556 = vmatpush3.bf16.msra.mxu0 %v1198_v60 }
 0x3b6   : > { %v1173_v11 = vadd.f32 %v1765_v21, %v1172_v51  ;;  %1557 = vmatprep.subr.bf16.mxu0 %v1207_v26 }
 0x3b8   : > { %v1174_v16 = vadd.f32 %v1767_v63, %v1173_v11 }
 0x3b9   : > { %1558 = vmatpush3.bf16.msra.mxu0 %v1199_v1  ;;  %v1253_v1 = vld [vmem:[%s2458_s7] sm:$0xf] }
 0x3ba   : > { %v1175_v28 = vadd.f32 %v1769_v31, %v1174_v16  ;;  %1559 = vmatprep.subr.bf16.mxu0 %v1208_v33  ;;  %1256 = vperm.xlu1 %1718, %v1253_v1   ;;  %v1362_v33 = vpop.permute.xlu0 %1361 }
 0x3bc   : > { %v1176_v57 = vadd.f32 %v1771_v4, %v1175_v28 }
 0x3bd   : > { %1560 = vmatpush3.bf16.msra.mxu0 %v1200_v5 }
 0x3be   : > { %v1177_v14 = vadd.f32 %v1773_v35, %v1176_v57  ;;  %1561 = vmatprep.subr.bf16.mxu0 %v1209_v46  ;;  %1368 = vperm.xlu1 %1718, %v1365_v48  }
 0x3c0   : > { %v1178_v22 = vadd.f32 %v1775_v37, %v1177_v14 }
 0x3c1   : > { %1562 = vmatpush3.bf16.msra.mxu0 %v1201_v47 }
 0x3c2   : > { %v1179_v56 = vadd.f32 %v1777_v10, %v1178_v22  ;;  %1621 = vmatprep.subr.mxu0 %v1890_v0 }
 0x3c4   : > { %v1180_v58 = vadd.f32 %v1779_v20, %v1179_v56  ;;  %1243 = vmatmul.mubr.bf16.vlgmr.msra.gmra.mrb[12].mxu0 %v1192_v54 }
 0x3c5   : > { %1623 = vmatprep.mubr.msk.f32.mxu0 %vm1892_vm2, %v1890_v0 }
 0x3c6   : > { %v1181_v30 = vadd.f32 %v1781_v27, %v1180_v58 }
 0x3c8   : > { %v1182_v60 = vadd.f32 %v1783_v39, %v1181_v30 }
 0x3ca   : > { %v1183_v62 = vadd.f32 %v1785_v32, %v1182_v60 }
 0x3cc   : > { %v1184_v40 = vadd.f32 %v1787_v36, %v1183_v62 }
 0x3ce   : > { %v1185_v44 = vadd.f32 %v1789_v41, %v1184_v40 }
 0x3d0   : > { %v1186_v3 = vrot.slane %v1185_v44, 4 }
 0x3d2   : > { %v1187_v61 = vadd.f32 %v1186_v3, %v1185_v44 }
 0x3d4   : > { %v1188_v38 = vrot.slane %v1187_v61, 2 }
 0x3d6   : > { %v1189_v55 = vadd.f32 %v1188_v38, %v1187_v61 }
 0x3d8   : > { %v1190_v0 = vrot.slane %v1189_v55, 1 }
 0x3da   : > { %v1191_v42 = vadd.f32 %v1190_v0, %v1189_v55 }
 0x3dc   : > { %1790 = vrcp.f32 %v1191_v42 }
 0x3e6   : > { %v1791_v9 = vpop.eup %1790 }
 0x439   : > { %v1257_v7 = vpop.permute.xlu1 %1256 }
 0x43d   : > { %v1369_v12 = vpop.permute.xlu1 %1368 }
 0x497   : > { %v1563_v5 = vpop.f32.mrb[12].mxu0 }
 0x498   : > { %v1564_v8 = vpop.f32.mrb[13].mxu0 }
 0x499   : > { %v1565_v59 = vadd.f32 %v1564_v8, %v1563_v5  ;;  %v1566_v45 = vpop.f32.mrb[14].mxu0 }
 0x49a   : > { %v1567_v2 = vpop.f32.mrb[15].mxu0 }
 0x49b   : > { %v1251_v47 = vmul.f32 %v1791_v9, %v1565_v59 }
 0x49d   : > { %1622 = vmatpush3.msra.mxu0 %v1251_v47 }
 0x49e   : > { %1624 = vmatmul.mubr.msk.f32.vlgmr.msra.gmra.mrb[10].mxu0 %vm809_vm4, %v1252_v15 }
 0x571   : > { %v1328_v49 = vpop.f32.mrb[10].mxu0 }
 0x572   : > { %v1329_v21 = vadd.f32 %v1328_v49, %v1257_v7  ;;  %v1625_v63 = vpop.f32.mrb[11].mxu0 }
 0x574   : > { %v1335_v50 = vadd.f32 %v1334_v19, %v1329_v21 }
 0x576   : > { %v1336_v25 = vsel %vm447_vm0, %v1335_v50, 0.0 }
 0x577   : > { %v1337_v31 = vrot.slane %v1336_v25, 4 }
 0x579   : > { %v1338_v4 = vadd.f32 %v1337_v31, %v1336_v25 }
 0x57b   : > { %v1339_v29 = vrot.slane %v1338_v4, 2 }
 0x57d   : > { %v1340_v52 = vadd.f32 %v1339_v29, %v1338_v4 }
 0x57f   : > { %v1341_v35 = vrot.slane %v1340_v52, 1 }
 0x581   : > { %v1342_v37 = vadd.f32 %v1341_v35, %v1340_v52 }
 0x583   : > { %v1344_v43 = vmul.f32 0.25, %v1342_v37 }
 0x585   : > { %v1345_v13 = vsub.f32 %v1335_v50, %v1344_v43 }
 0x587   : > { %v1346_v10 = vmul.f32 %v1345_v13, %v1345_v13 }
 0x589   : > { %v1347_v6 = vsel %vm447_vm0, %v1346_v10, 0.0 }
 0x58a   : > { %v1348_v20 = vrot.slane %v1347_v6, 4 }
 0x58c   : > { %v1349_v18 = vadd.f32 %v1348_v20, %v1347_v6 }
 0x58e   : > { %v1350_v23 = vrot.slane %v1349_v18, 2 }
 0x590   : > { %v1351_v27 = vadd.f32 %v1350_v23, %v1349_v18 }
 0x592   : > { %v1352_v39 = vrot.slane %v1351_v27, 1 }
 0x594   : > { %v1353_v24 = vadd.f32 %v1352_v39, %v1351_v27 }
 0x596   : > { %v1354_v26 = vmul.f32 0.25, %v1353_v24 }
 0x598   : > { %v1355_v32 = vadd.f32 1e-06, %v1354_v26 }
 0x59a   : > { %1792 = vrsqrt.f32 %v1355_v32 }
 0x5a4   : > { %v1793_v36 = vpop.eup %1792 }
 0x5a5   : > { %v1357_v53 = vmul.f32 %v1793_v36, %v1345_v13 }
 0x5a7   : > { %v1364_v41 = vmul.f32 %v1362_v33, %v1357_v53 }
 0x5a9   : > { %v1371_v46 = vadd.f32 %v1369_v12, %v1364_v41 }
 0x5ab   : > { %1372 = vst [vmem:[%s417_s17] sm:$0xf] %v1371_v46 }
 0x5ac   : > { %1807 = shalt.err (!%p1804_p7)
}
 0x5ad   : > { %s1808_s3 = scalar_lea.hbm %s2398_s15, 64  ;;  %s1812_s25 = scalar_lea.hbm %s2462_s11, 256 }
 0x5ae   : > { %p1809_p9 = scmp.ne.s32.totalorder %s2398_s15, %s1808_s3  ;;  %p1813_p12 = scmp.lt.u32.totalorder %s2398_s15, %s2462_s11 }
 0x5af   : > { %p1814_p13 = scmp.lt.u32.totalorder %s1812_s25, %s1808_s3  ;;  %p1816_p1 = scmp.lt.u32.totalorder %s1808_s3, %s2398_s15 }
 0x5b0   : > { %p1810_p10 = pnand %p1809_p9, %p2010_p3 }
 0x5b1   : > { %p1815_p0 = por %p1814_p13, %p1813_p12 }
 0x5b2   : > { %p1811_p11 = pneg %p1810_p10 }
 0x5b3   : > { %p1817_p2 = por %p1816_p1, %p1815_p0 }
 0x5b5   : > { %p1818_p4 = pnand %p1817_p2, %p1811_p11 }
 0x5b7   : > { %1821 = shalt.err (!%p1818_p4)
}
 0x5b8   : > { %1641 = dma.vmem_to_hbm [thread:$0]  (%p2010_p3), %s2400_s27, 64, %s2398_s15, %s1374_s22  }
 0x5b9 PF: > { %p1647_p5 = scmp.ge.s32.totalorder %s1888_s26, 2  ;;  %s1401_s17 = sand.u32 1, %s1860_s19  }
 0x5ba   : > { %s1402_s30 = scalar_lea.sflag [#allocation4], %s1401_s17 }
 0x5bb   : > { %p1644_p6 = pnand %p1647_p5, %p2019_p8 }
 0x5bd   : > { %1855 = dma.done.wait (!%p1644_p6), %s1402_s30, 64  }
 0x5be   : > { %1857 = vsyncadd (!%p1644_p6), %s1402_s30, 4294967232  ;;  %s25_s26 = sadd.s32 1, %s1888_s26   ;;  %s2478_s14 = sld [smem:[#allocation6_spill]] }
 0x5bf   : > { %p22_p7 = scmp.ge.s32.totalorder %s25_s26, 6   ;;  %s2479_s21 = sld [smem:[#allocation11_spill]] }
 0x5c0   : > { %s2480_s22 = sld [smem:[#allocation7_spill]]  ;;  %s2481_s23 = sld [smem:[#allocation8_spill]] }
 0x5c1   : > { %s2482_s24 = sld [smem:[#allocation9_spill]]  ;;  %s2483_s25 = sld [smem:[#allocation10_spill]] }
 0x5c2   : > { %s2484_s19 = smov %s1864_s20  ;;  %24 = sbr.rel (!%p22_p7) target bundleno = 8 (0x8), region = 102 }
 0x5c4   : > { %s2485_s20 = smov %s2478_s14 }
 0x5c9   :  { %1407 = vsyncpa [#allocation4], 1 }
 0x5ca   :  { %1409 = vsyncpa [#allocation4 + $0x1], 1 }

</bundles_post_ra>
